<compile_context>
chip_gen: v7x
topology: tpu7x:2x2x1
jax: 0.10.0
libtpu: 0.0.40
codegen_flags: <defaults>
</compile_context>

<pallas_src>
import jax
import jax.numpy as jnp
from jax.experimental import pallas as pl
from jax.experimental.pallas import tpu as pltpu

BN_EPS = 1e-5


def _cdiv(a, b):
    return -(-a // b)


def _round_up(x, m):
    return _cdiv(x, m) * m


def _spec(shape, index_map, buffers=None):
    """BlockSpec with optional N-deep pipelining; falls back to default double-buffering."""
    if buffers is not None and hasattr(pl, "Buffered"):
        try:
            return pl.BlockSpec(shape, index_map, pipeline_mode=pl.Buffered(buffers))
        except TypeError:
            pass
    return pl.BlockSpec(shape, index_map)


# --------------------------------------------------------------------------- #
# Kernel 1: TransposeModule.forward == inputs.transpose(1, 2)
# --------------------------------------------------------------------------- #
def _transpose_kernel(x_ref, o_ref):
    o_ref[...] = x_ref[...].T          # (tt, td) -> (td, tt), XLU transpose


def _pick_dim_tile(dim, max_tile):
    # Largest multiple of 128 <= max_tile that divides dim; else the full dim
    # (full-dim blocks are always legal; small dims stay tiny in VMEM).
    if dim % 128 == 0:
        cap = min(max_tile, dim)
        for cand in range(cap - cap % 128, 0, -128):
            if dim % cand == 0:
                return cand
    return dim


def transpose_module_pallas(x, *, tile_t=512, tile_d=512):
    """TransposeModule: (B, T, D) -> (B, D, T).

    Tiled over (T, D) so in+out blocks stay a few MiB even double-buffered.
    NOTE: for T < 128 the (D, T) output store is lane-sparse (masked vst); prefer folding
    the transpose into the consumer (the fused score-MLP below does exactly that).
    """
    B, T, D = x.shape
    tt = _pick_dim_tile(T, tile_t)
    td = _pick_dim_tile(D, tile_d)
    return pl.pallas_call(
        _transpose_kernel,
        grid=(B, T // tt, D // td),
        in_specs=[pl.BlockSpec((None, tt, td), lambda b, i, j: (b, i, j))],
        out_specs=pl.BlockSpec((None, td, tt), lambda b, i, j: (b, j, i)),
        out_shape=jax.ShapeDtypeStruct((B, D, T), x.dtype),
        compiler_params=pltpu.CompilerParams(
            dimension_semantics=("parallel", "parallel", "parallel")),
    )(x)


# --------------------------------------------------------------------------- #
# Kernel 2: score_mlp forward (eval mode, BN folded into weights)
# --------------------------------------------------------------------------- #
def _score_mlp_kernel(x_ref, w1_ref, b1_ref, w2_ref, b2_ref, w3_ref, b3_ref, o_ref):
    # layer 1: Linear with eval-mode BN + bias folded into (w1, b1); ReLU; Dropout = id.
    h = jnp.dot(x_ref[...], w1_ref[...], preferred_element_type=jnp.float32)
    h = jnp.maximum(h + b1_ref[...], 0.0)

    # layer 2: same.
    h = jnp.dot(h.astype(w2_ref.dtype), w2_ref[...], preferred_element_type=jnp.float32)
    h = jnp.maximum(h + b2_ref[...], 0.0)

    # output layer: Linear(HID, 1) as a lane reduction (keeps the MXU free) + sigmoid,
    # written lane-dense as a (tr/128, 128) slab.  The cross-lane reduce / relayout is
    # XLU work -- free filler while the kernel is mem-bound; revisit only if it binds.
    g, lanes = o_ref.shape
    h3 = h.reshape(g, lanes, h.shape[-1])                  # leading split, layout-preserving
    s = jnp.sum(h3 * w3_ref[...], axis=-1) + b3_ref[...]   # (g, 128)
    o_ref[...] = jax.nn.sigmoid(s)


def fold_bn_params(p, eps=BN_EPS, pad_hidden_to=128):
    """Fold eval-mode BatchNorm1d (+ Linear bias) into the weights once, and zero-pad the
    hidden dim to a lane-dense multiple of 128.  Padded channels are exact zeros through
    ReLU and w3, so results are unchanged while vregs/MXU-N are fully dense."""
    s1 = p["g1"] * jax.lax.rsqrt(p["v1"] + eps)
    s2 = p["g2"] * jax.lax.rsqrt(p["v2"] + eps)
    w1 = p["w1"] * s1
    b1 = (p["b1"] - p["m1"]) * s1 + p["be1"]
    w2 = p["w2"] * s2
    b2 = (p["b2"] - p["m2"]) * s2 + p["be2"]
    w3, b3 = p["w3"], p["b3"]
    hid = w1.shape[1]
    hp = _round_up(hid, pad_hidden_to)
    if hp != hid:
        pad = hp - hid
        w1 = jnp.pad(w1, ((0, 0), (0, pad)))
        b1 = jnp.pad(b1, ((0, 0), (0, pad)))
        w2 = jnp.pad(w2, ((0, pad), (0, pad)))
        b2 = jnp.pad(b2, ((0, 0), (0, pad)))
        w3 = jnp.pad(w3, ((0, pad), (0, 0)))
    return {"w1": w1, "b1": b1, "w2": w2, "b2": b2, "w3": w3, "b3": b3}


def score_mlp_pallas(topic_similar, p, *, tile_rows=8192, use_bf16=True):
    """topic_similar: (B, T, similarity_dim) -> (B, T) scores in [0, 1] (eval mode)."""
    B, T, D = topic_similar.shape
    N = B * T
    f = fold_bn_params(p)
    HP = f["w1"].shape[1]

    # MXU / streamed-activation dtype.  Elementwise math stays f32 everywhere
    # (v5e has no bf16 VPU/EUP); bf16 halves the streamed HBM bytes, which is the
    # bottleneck of this mem-bound kernel on every TPU generation.
    mxu_dtype = jnp.bfloat16 if use_bf16 else jnp.float32

    # Balanced row tiles (multiple of 128 so the output slab is lane-dense), large by
    # default to amortize per-grid-step overhead, and >= 2 tiles whenever there is
    # enough work so the "parallel" axis can use both v7x TensorCores.
    nt = max(1, _cdiv(N, tile_rows))
    tr = _round_up(_cdiv(N, nt), 128)
    if N > 128 and _cdiv(_round_up(N, 128), tr) < 2:
        tr = _round_up(_cdiv(N, 2), 128)
    tr = max(128, min(tr, _round_up(N, 128)))
    n_pad = _round_up(N, tr)
    num_tiles = n_pad // tr
    g = tr // 128

    x = topic_similar.reshape(N, D)
    if n_pad != N:
        x = jnp.pad(x, ((0, n_pad - N), (0, 0)))
    x = x.astype(mxu_dtype)

    w1 = f["w1"].astype(mxu_dtype)
    w2 = f["w2"].astype(mxu_dtype)
    b1 = f["b1"].astype(jnp.float32)
    b2 = f["b2"].astype(jnp.float32)
    w3 = f["w3"].reshape(1, 1, HP).astype(jnp.float32)
    b3 = f["b3"].reshape(1, 1).astype(jnp.float32)

    const2 = lambda i: (0, 0)
    grid_spec = pltpu.PrefetchScalarGridSpec(
        num_scalar_prefetch=0,
        grid=(num_tiles,),
        in_specs=[
            # streamed activations: 3-deep pipeline hides DMA issue latency (v7x)
            _spec((tr, D), lambda i: (i, 0), buffers=3),
            # weights/biases: constant index_map -> fetched once, VMEM-resident
            pl.BlockSpec((D, HP), const2),
            pl.BlockSpec((1, HP), const2),
            pl.BlockSpec((HP, HP), const2),
            pl.BlockSpec((1, HP), const2),
            pl.BlockSpec((1, 1, HP), lambda i: (0, 0, 0)),
            pl.BlockSpec((1, 1), const2),
        ],
        out_specs=pl.BlockSpec((g, 128), lambda i: (i, 0)),   # lane-dense score slab
    )

    itemsize = jnp.dtype(mxu_dtype).itemsize
    cost = pl.CostEstimate(
        flops=2 * n_pad * (D * HP + HP * HP + HP),
        transcendentals=n_pad,
        bytes_accessed=n_pad * D * itemsize                       # streamed activations
        + (D * HP + HP * HP) * itemsize + (3 * HP + 1) * 4        # resident weights (once)
        + n_pad * 4,                                              # scores
    )

    out = pl.pallas_call(
        _score_mlp_kernel,
        grid_spec=grid_spec,
        out_shape=jax.ShapeDtypeStruct((n_pad // 128, 128), jnp.float32),
        compiler_params=pltpu.CompilerParams(
            # row tiles are independent -> both v7x TCs; no vmem_limit_bytes needed:
            # working set is ~2 MiB, far under every generation's scoped default.
            dimension_semantics=("parallel",),
        ),
        cost_estimate=cost,
    )(x, w1, b1, w2, b2, w3, b3)

    return out.reshape(n_pad)[:N].reshape(B, T)


# --------------------------------------------------------------------------- #
# Deterministic parameter construction (mirrors nn.Linear/BatchNorm1d, eval stats)
# --------------------------------------------------------------------------- #
def _kaiming_normal(key, fan_in, fan_out):
    return jax.random.normal(key, (fan_in, fan_out), jnp.float32) * jnp.sqrt(2.0 / fan_in)


def _linear_bias(key, fan_in, fan_out):
    bound = 1.0 / jnp.sqrt(fan_in)
    return jax.random.uniform(key, (1, fan_out), jnp.float32, -bound, bound)


def make_params(key, similarity_dim, hidden_dim):
    ks = jax.random.split(key, 16)
    h = hidden_dim
    return {
        "w1": _kaiming_normal(ks[0], similarity_dim, h),
        "b1": _linear_bias(ks[1], similarity_dim, h),
        "g1": 1.0 + 0.1 * jax.random.normal(ks[2], (1, h), jnp.float32),
        "be1": 0.1 * jax.random.normal(ks[3], (1, h), jnp.float32),
        "m1": 0.1 * jax.random.normal(ks[4], (1, h), jnp.float32),
        "v1": 1.0 + 0.5 * jax.random.uniform(ks[5], (1, h), jnp.float32),
        "w2": _kaiming_normal(ks[6], h, h),
        "b2": _linear_bias(ks[7], h, h),
        "g2": 1.0 + 0.1 * jax.random.normal(ks[8], (1, h), jnp.float32),
        "be2": 0.1 * jax.random.normal(ks[9], (1, h), jnp.float32),
        "m2": 0.1 * jax.random.normal(ks[10], (1, h), jnp.float32),
        "v2": 1.0 + 0.5 * jax.random.uniform(ks[11], (1, h), jnp.float32),
        "w3": _kaiming_normal(ks[12], h, 1),
        "b3": _linear_bias(ks[13], h, 1),
    }


def score_mlp_reference(topic_similar, p):
    """Pure-JAX reference of the score MLP (eval mode, unfolded BN), for validation."""
    B, T, D = topic_similar.shape
    hi = jax.lax.Precision.HIGHEST
    x = topic_similar.reshape(B * T, D)
    h = jnp.dot(x, p["w1"], precision=hi) + p["b1"]
    h = (h - p["m1"]) / jnp.sqrt(p["v1"] + BN_EPS) * p["g1"] + p["be1"]
    h = jnp.maximum(h, 0.0)
    h = jnp.dot(h, p["w2"], precision=hi) + p["b2"]
    h = (h - p["m2"]) / jnp.sqrt(p["v2"] + BN_EPS) * p["g2"] + p["be2"]
    h = jnp.maximum(h, 0.0)
    s = jax.nn.sigmoid(jnp.dot(h, p["w3"], precision=hi) + p["b3"])
    return s.reshape(B, T)


# --------------------------------------------------------------------------- #
if __name__ == "__main__":
    key = jax.random.PRNGKey(0)
    k1, k2, k3, k4 = jax.random.split(key, 4)

    # --- Spec module: TransposeModule.forward == inputs.transpose(1, 2) -------------
    B, T, D = 2, 8, 64
    x = jax.random.normal(k1, (B, T, D), jnp.float32)
    y = jax.block_until_ready(transpose_module_pallas(x))
    assert y.shape == (B, D, T)
    assert bool(jnp.array_equal(y, jnp.swapaxes(x, 1, 2)))

    # Tiled path: 2-D (T, D) grid, lane/sublane-aligned blocks, bounded VMEM.
    x2 = jax.random.normal(k2, (2, 256, 256), jnp.float32)
    y2 = jax.block_until_ready(transpose_module_pallas(x2, tile_t=128, tile_d=128))
    assert y2.shape == (2, 256, 256)
    assert bool(jnp.array_equal(y2, jnp.swapaxes(x2, 1, 2)))

    # --- Fused score-MLP (the context in which TransposeModule is used) -------------
    SIM_DIM, HID = 32, 64
    params = make_params(k3, SIM_DIM, HID)

    ts = jnp.tanh(jax.random.normal(k4, (2, 8, SIM_DIM), jnp.float32))
    ref = score_mlp_reference(ts, params)

    s_f32 = jax.block_until_ready(score_mlp_pallas(ts, params, use_bf16=False))
    assert s_f32.shape == (2, 8)
    assert bool(jnp.allclose(s_f32, ref, atol=1e-4, rtol=1e-4))

    s_bf16 = jax.block_until_ready(score_mlp_pallas(ts, params))      # bf16 stream (default)
    assert bool(jnp.allclose(s_bf16, ref, atol=3e-2, rtol=3e-2))

    # Multi-tile path: balanced row tiles, >= 2 "parallel" grid steps (v7x megacore),
    # row padding sliced off, 128-padded hidden dim, resident weights.
    ts_big = jnp.tanh(jax.random.normal(jax.random.PRNGKey(1), (2, 1000, SIM_DIM), jnp.float32))
    ref_big = score_mlp_reference(ts_big, params)
    s_big = jax.block_until_ready(score_mlp_pallas(ts_big, params))
    assert s_big.shape == (2, 1000)
    assert bool(jnp.allclose(s_big, ref_big, atol=3e-2, rtol=3e-2))
    s_big_f32 = jax.block_until_ready(score_mlp_pallas(ts_big, params, use_bf16=False))
    assert bool(jnp.allclose(s_big_f32, ref_big, atol=1e-4, rtol=1e-4))

    print("KERNEL_OK")
</pallas_src>

<mosaic_0001>
module attributes {stable_mosaic.version = 11 : i64} {
  func.func @_transpose_kernel(%arg0: i32, %arg1: i32, %arg2: i32, %arg3: memref<1x8x64xf32, #tpu.memory_space<vmem>>, %arg4: memref<1x64x8xf32, #tpu.memory_space<vmem>>) attributes {dimension_semantics = [#tpu.dimension_semantics<parallel>, #tpu.dimension_semantics<parallel>, #tpu.dimension_semantics<parallel>], iteration_bounds = array<i64: 2, 1, 1>, scalar_prefetch = 0 : i64, scratch_operands = 0 : i64, tpu.core_type = #tpu.core_type<tc>, window_params = [{transform_indices = @transform_0, window_bounds = array<i64: 1, 8, 64>}, {transform_indices = @transform_1, window_bounds = array<i64: 1, 64, 8>}]} {
    %c0 = arith.constant 0 : index
    %c0_0 = arith.constant 0 : index
    %c0_1 = arith.constant 0 : index
    %0 = vector.load %arg3[%c0, %c0_0, %c0_1] : memref<1x8x64xf32, #tpu.memory_space<vmem>>, vector<1x8x64xf32>
    %1 = vector.shape_cast %0 : vector<1x8x64xf32> to vector<8x64xf32>
    %2 = tpu.transpose %1, [1, 0] : vector<8x64xf32> -> vector<64x8xf32>
    %c0_2 = arith.constant 0 : index
    %c0_3 = arith.constant 0 : index
    %c0_4 = arith.constant 0 : index
    %3 = vector.load %arg4[%c0_2, %c0_3, %c0_4] : memref<1x64x8xf32, #tpu.memory_space<vmem>>, vector<1x64x8xf32>
    %4 = vector.shape_cast %3 : vector<1x64x8xf32> to vector<64x8xf32>
    %5 = vector.shape_cast %2 : vector<64x8xf32> to vector<1x64x8xf32>
    tpu.vector_store %arg4[%c0_2, %c0_3, %c0_4], %5 {strides = array<i32>} : memref<1x64x8xf32, #tpu.memory_space<vmem>>, vector<1x64x8xf32>,
    return
  }
  func.func @transform_0(%arg0: i32, %arg1: i32, %arg2: i32) -> (i32, i32, i32) {
    %c0_i32 = arith.constant 0 : i32
    return %arg0, %arg1, %arg2 : i32, i32, i32
  }
  func.func @transform_1(%arg0: i32, %arg1: i32, %arg2: i32) -> (i32, i32, i32) {
    %c0_i32 = arith.constant 0 : i32
    return %arg0, %arg2, %arg1 : i32, i32, i32
  }
}

</mosaic_0001>

<bundles_post_ra>
// kernel: tpu_custom_call.1
= control target key start
LH: loop header
LB: loop body
LE: loop exit
PB: predicated region body
PF: predicated region fallthrough
CT: control target
= control target key end

     0   :  { %6 = vsyncpa [#allocation3], 0  ;;  %s622_s0 = inlined_call_operand.hbm [shape: f32[2,8,64], index: 0, kind: input, shape index: {}]   ;;  %s623_s1 = inlined_call_operand.vmem [shape: f32[2,64,8], index: 1, kind: output, shape index: {}]  }
   0x1   :  { %8 = vsyncpa [#allocation3 + $0x1], 0  ;;  %s489_s6 = smov 0   ;;  %s491_s7 = smov 0  }
   0x2   :  { %s493_s8 = smov 0   ;;  %s495_s9 = smov 0  }
   0x3   :  { %s497_s10 = smov 0   ;;  %s499_s11 = smov 0  }
   0x4 LB: > { %s327_s12 = sadd.s32 4294967295, %s476_s11   ;;  %s33_s13 = sadd.s32 1, %s472_s10  ;;  %s476_s11 = sphi %s499_s11, %s14_s11   ;;  %s472_s10 = sphi %s497_s10, %s633_s10   ;;  %s468_s9 = sphi %s495_s9, %s632_s9   ;;  %s464_s8 = sphi %s493_s8, %s631_s8   ;;  %s460_s7 = sphi %s491_s7, %s630_s7   ;;  %s456_s6 = sphi %s489_s6, %s629_s6  }
   0x5   : > { %p35_p0 = scmp.ge.s32.totalorder %s33_s13, 2  ;;  %s44_s14 = sadd.s32 1, %s464_s8 }
   0x6   : > { %p51_p1 = scmp.ne.s32.totalorder %s464_s8, %s460_s7  ;;  %p52_p2 = scmp.eq.s32.totalorder %s476_s11, 0 }
   0x7   : > { %s635_s13 = smov (%p35_p0, %s33_s13), 0  ;;  %p57_p4 = scmp.ne.s32.totalorder %s460_s7, %s456_s6 }
   0x8   : > { %p525_p3 = por %p52_p2, %p51_p1  ;;  %s37_s16 = ssub.s32 %s472_s10, %s635_s13 }
   0x9   : > { %p58_p5 = scmp.eq.s32.totalorder %s327_s12, 0  ;;  %p42_p6 = scmp.eq.s32.totalorder %s37_s16, 0 }
   0xa   : > { %p346_p8 = scmp.lt.s32.totalorder %s476_s11, 2  ;;  %s111_s19 = sand.u32 1, %s464_s8  }
   0xb   : > { %p532_p7 = por %p58_p5, %p57_p4  ;;  %s332_s20 = sshll.u32 %s472_s10, 7 }
   0xc   : > { %s538_s18 = scalar_select %p42_p6, %s464_s8, %s44_s14  }
   0xd   : > { %s331_s21 = sshll.u32 %s111_s19, 3  ;;  %s545_s24 = scalar_lea.hbm %s622_s0, %s332_s20 }
   0xe   : > { %s115_s25 = scalar_lea.vmem [#allocation2], %s331_s21  ;;  %p549_p9 = pnand %p346_p8, %p525_p3 }
   0xf   : > { %s124_s26 = sshll.u32 %s115_s25, 4  ;;  %s112_s28 = scalar_lea.sflag [#allocation3], %s111_s19  ;;  %s553_s26 = int_to_ptr.vmem [resolvable:$true] %s124_s26 }
  0x10   : > { %s396_s29 = scalar_lea.hbm %s545_s24, 128  ;;  %p398_p13 = pneg %p549_p9 }
  0x11   : > { %p397_p12 = scmp.ne.s32.totalorder %s545_s24, %s396_s29  ;;  %s401_s3 = scalar_lea.hbm %s622_s0, 256 }
  0x12   : > { %p402_p2 = scmp.lt.u32.totalorder %s545_s24, %s622_s0  ;;  %p403_p3 = scmp.lt.u32.totalorder %s401_s3, %s396_s29 }
  0x13   : > { %p399_p0 = pnand %p398_p13, %p397_p12  ;;  %p405_p5 = scmp.lt.u32.totalorder %s396_s29, %s545_s24 }
  0x14   : > { %p404_p4 = por %p403_p3, %p402_p2 }
  0x15   : > { %p400_p1 = pneg %p399_p0 }
  0x16   : > { %p406_p6 = por %p405_p5, %p404_p4 }
  0x18   : > { %p407_p8 = pnand %p406_p6, %p400_p1 }
  0x1a   : > { %410 = shalt.err (!%p407_p8)
}
  0x1b   : > { %s411_s6 = scalar_lea.vmem %s553_s26, 128  ;;  %s478_s12 = smov [#allocation2]  }
  0x1c   : > { %p412_p12 = scmp.ne.s32.totalorder %s553_s26, %s411_s6  ;;  %s416_s14 = sshll.u32 %s478_s12, 4  ;;  %s417_s14 = int_to_ptr.vmem [resolvable:$false] %s416_s14 }
  0x1d   : > { %s418_s15 = scalar_lea.vmem %s417_s14, 256  ;;  %p419_p11 = scmp.lt.s32.totalorder %s553_s26, %s417_s14 }
  0x1e   : > { %p414_p0 = pnand %p412_p12, %p398_p13  ;;  %p420_p2 = scmp.lt.s32.totalorder %s418_s15, %s411_s6 }
  0x20   : > { %p415_p10 = pneg %p414_p0  ;;  %p421_p3 = por %p420_p2, %p419_p11 }
  0x22   : > { %p422_p4 = pnand %p421_p3, %p415_p10 }
  0x24   : > { %425 = shalt.err (!%p422_p4)
}
  0x25   : > { %345 = dma.hbm_to_vmem [thread:$0]  (!%p549_p9), %s545_s24, 128, %s553_s26, %s112_s28  }
  0x26   : > { %p627_p1 = scmp.lt.s32.totalorder %s476_s11, 3  ;;  %p628_p5 = scmp.ge.s32.totalorder %s476_s11, 1 }
  0x28   : > { %p130_p13 = pnand %p628_p5, %p627_p1 }
  0x29   : > { %s135_s16 = sand.u32 (!%p130_p13), 1, %s460_s7  }
  0x2a   : > { %133 = sbr.rel (%p130_p13) target bundleno = 209 (0xd1), region = 24  ;;  %s334_s19 = sshll.u32 (!%p130_p13), %s135_s16, 3 }
  0x2b   : > { %s136_s20 = scalar_lea.sflag (!%p130_p13), [#allocation3], %s135_s16  ;;  %s139_s21 = scalar_lea.vmem (!%p130_p13), [#allocation2], %s334_s19 }
  0x31   : > { %451 = dma.done.wait (%p532_p7), %s136_s20, 128  }
  0x32   : > { %453 = vsyncadd (%p532_p7), %s136_s20, 4294967168  ;;  %v178_v0 = vld [vmem:[%s139_s21] sm:$0xff]  ;;  %p166_p9 = scmp.lt.s32.totalorder %s468_s9, 1  ;;  %vm211_vm0 = vcmask 64512  }
  0x33   : > { %179 = vxpose.xlu0.b32.start.end [1/1] (short) (narrow) %v178_v0, 64 }
  0x34   : > { %s637_s9 = smov (!%p166_p9, %s468_s9), 1 }
  0x35   : > { %s339_s22 = sshll.u32 %s637_s9, 6 }
  0x36   : > { %s176_s25 = scalar_lea.vmem %s623_s1, %s339_s22 }
  0xb3   : > { %v195_v1 = vpop.trf.xlu0 }
  0xb4   : > { %212 = vst.msk [vmem:[%s176_s25] sm:$0xff] %vm211_vm0, %v195_v1 }
  0xb7   : > { %v196_v2 = vpop.trf.xlu0 }
  0xb8   : > { %213 = vst.msk [vmem:[%s176_s25 + $0x8] sm:$0xff] %vm211_vm0, %v196_v2 }
  0xbb   : > { %v197_v3 = vpop.trf.xlu0 }
  0xbc   : > { %214 = vst.msk [vmem:[%s176_s25 + $0x10] sm:$0xff] %vm211_vm0, %v197_v3 }
  0xbf   : > { %v198_v4 = vpop.trf.xlu0 }
  0xc0   : > { %215 = vst.msk [vmem:[%s176_s25 + $0x18] sm:$0xff] %vm211_vm0, %v198_v4 }
  0xc3   : > { %v199_v5 = vpop.trf.xlu0 }
  0xc4   : > { %216 = vst.msk [vmem:[%s176_s25 + $0x20] sm:$0xff] %vm211_vm0, %v199_v5 }
  0xc7   : > { %v200_v6 = vpop.trf.xlu0 }
  0xc8   : > { %217 = vst.msk [vmem:[%s176_s25 + $0x28] sm:$0xff] %vm211_vm0, %v200_v6 }
  0xcb   : > { %v201_v7 = vpop.trf.xlu0 }
  0xcc   : > { %218 = vst.msk [vmem:[%s176_s25 + $0x30] sm:$0xff] %vm211_vm0, %v201_v7 }
  0xcf   : > { %v202_v8 = vpop.trf.xlu0 }
  0xd0   : > { %219 = vst.msk [vmem:[%s176_s25 + $0x38] sm:$0xff] %vm211_vm0, %v202_v8 }
  0xd1 PF: > { %s14_s11 = sadd.s32 1, %s476_s11   ;;  %s629_s6 = smov %s460_s7 }
  0xd2   : > { %p11_p7 = scmp.ge.s32.totalorder %s14_s11, 4   ;;  %s630_s7 = smov %s464_s8 }
  0xd3   : > { %s631_s8 = smov %s538_s18  ;;  %s632_s9 = smov %s472_s10 }
  0xd4   : > { %s633_s10 = smov %s635_s13  ;;  %13 = sbr.rel (!%p11_p7) target bundleno = 4 (0x4), region = 64 }
  0xdb   :  { %256 = vsyncpa [#allocation3], 1 }
  0xdc   :  { %258 = vsyncpa [#allocation3 + $0x1], 1 }

</bundles_post_ra>
